<compile_context>
chip_gen: v5e
topology: v5e:2x2
jax: 0.10.0
libtpu: 0.0.40
codegen_flags: <defaults>
</compile_context>

<pallas_src>
import functools
import math

import jax
import jax.numpy as jnp
from jax.experimental import pallas as pl
from jax.experimental.pallas import tpu as pltpu


def _cross_attn_kernel(x_ref, kt_ref, v_ref,
                       wq_ref, bq_ref, wo_ref, bo_ref,
                       gamma_ref, beta_ref,
                       out_ref, *rest,
                       num_heads: int, group: int, eps: float,
                       need_weights: bool):
    if need_weights:
        attn_ref, xn_s, acc_s = rest
    else:
        attn_ref = None
        xn_s, acc_s = rest

    gi = pl.program_id(2)            # head-group index (innermost, "arbitrary")
    n_groups = pl.num_programs(2)
    cdt = x_ref.dtype                # MXU / exp compute dtype == input dtype
    dh = kt_ref.shape[1]

    # ---- once per (batch, q-tile): pre-LayerNorm (f32 stats) + accumulator init
    @pl.when(gi == 0)
    def _():
        xf = x_ref[...].astype(jnp.float32)
        mu = jnp.mean(xf, axis=-1, keepdims=True)
        var = jnp.mean((xf - mu) * (xf - mu), axis=-1, keepdims=True)
        xn = (xf - mu) * jax.lax.rsqrt(var + eps)
        xn = xn * gamma_ref[...] + beta_ref[...]
        xn_s[...] = xn.astype(xn_s.dtype)
        acc_s[...] = jnp.zeros_like(acc_s)
        if need_weights:
            attn_ref[...] = jnp.zeros_like(attn_ref)

    # ---- grouped Q projection: contraction over full D, output width G*dh
    q_g = (jnp.dot(xn_s[...], wq_ref[gi], preferred_element_type=jnp.float32)
           + bq_ref[gi]).astype(cdt)                       # (tq, G*dh)

    # ---- per-head attention inside the group (static unroll)
    ctx_parts = []
    w_sum = None
    for hg in range(group):
        h = gi * group + hg
        q_h = q_g[:, hg * dh:(hg + 1) * dh]                # (tq, dh) lane slice
        s = jnp.dot(q_h, kt_ref[h],                        # K^T resident: no vxpose
                    preferred_element_type=jnp.float32)    # (tq, Sk)
        m = jnp.max(s, axis=-1, keepdims=True)
        e = jnp.exp((s - m).astype(cdt))                   # exp in input dtype
        ef = e.astype(jnp.float32)
        l = jnp.sum(ef, axis=-1, keepdims=True)
        inv = 1.0 / l                                      # exact, (tq,1) only
        # deferred normalization: normalize the (tq,dh) context, not (tq,Sk) p
        ctx_h = jnp.dot(e, v_ref[h],
                        preferred_element_type=jnp.float32) * inv
        ctx_parts.append(ctx_h.astype(cdt))
        if need_weights:
            p_n = ef * inv
            w_sum = p_n if w_sum is None else w_sum + p_n

    ctx_g = ctx_parts[0] if group == 1 else jnp.concatenate(ctx_parts, axis=-1)

    # ---- grouped output projection: contraction over G*dh, accumulate in f32
    acc_s[...] += jnp.dot(ctx_g, wo_ref[gi],
                          preferred_element_type=jnp.float32)   # (tq, D)

    if need_weights:
        attn_ref[...] += (w_sum * (1.0 / num_heads)).astype(attn_ref.dtype)

    # ---- finalize: output bias + residual in the input dtype
    @pl.when(gi == n_groups - 1)
    def _():
        o = acc_s[...] + bo_ref[...]
        out_ref[...] = x_ref[...] + o.astype(out_ref.dtype)


def _pick_tq(sq, block_q, dtype):
    """Dtype-aware q-tile pick; pads Sq when no clean divisor exists."""
    if sq <= block_q:
        return sq, sq
    min_mult = 16 if dtype == jnp.bfloat16 else 8
    cands = list(range(block_q, min_mult - 1, -min_mult))
    cands.sort(key=lambda c: (c % 128 == 0, c), reverse=True)  # prefer MXU-wide
    for c in cands:
        if sq % c == 0:
            return c, sq
    tq = max(min_mult, (block_q // min_mult) * min_mult)
    sq_pad = ((sq + tq - 1) // tq) * tq
    return tq, sq_pad


def cross_attention_layer(x, y, params, *, num_heads: int, eps: float = 1e-5,
                          need_weights: bool = True, block_q: int = 256,
                          group_lanes: int = 256,
                          vmem_limit_bytes: int = 64 * 1024 * 1024):
    """Pre-LN cross-attention layer.  x: (B,Sq,D) decoder stream, y: (B,Sk,D) encoder.

    `params` holds the PyTorch module's native tensors:
      in_proj_weight (3D, D), in_proj_bias (3D,), out_proj_weight (D, D),
      out_proj_bias (D,), ln_gamma (D,), ln_beta (D,).
    Returns (output, attn_weights or None); dropout p=0.0 -> identity (eval).
    """
    B, Sq, D = x.shape
    _, Sk, _ = y.shape
    H = num_heads
    assert D % H == 0, "d_model must be divisible by num_heads"
    dh = D // H
    cdt = x.dtype

    # ---- head grouping: G heads per step so G*dh ~ MXU width (256 v6e/v7x).
    G = max(1, min(H, group_lanes // max(dh, 1)))
    while H % G:
        G -= 1
    nG = H // G

    # ---------------- parameter prep (XLA side, one-time)
    wq, wk, wv = jnp.split(params["in_proj_weight"], 3, axis=0)   # torch (out,in)
    bq, bk, bv = jnp.split(params["in_proj_bias"], 3)
    scale = 1.0 / math.sqrt(dh)

    def per_head_cols(w):          # (D_out, D_in) -> (H, D_in, dh)
        return jnp.transpose(w.reshape(H, dh, D), (0, 2, 1))

    wq_h = per_head_cols(wq) * scale                      # fold 1/sqrt(dh) in
    wq_g = (wq_h.reshape(nG, G, D, dh).transpose(0, 2, 1, 3)
            .reshape(nG, D, G * dh)).astype(cdt)          # (nG, D, G*dh)
    bq_g = (bq * scale).astype(jnp.float32).reshape(nG, 1, G * dh)

    wo_full = jnp.transpose(params["out_proj_weight"])    # (D_in, D_out)
    wo_g = wo_full.reshape(nG, G * dh, D).astype(cdt)     # (nG, G*dh, D)
    bo = params["out_proj_bias"].astype(jnp.float32).reshape(1, D)
    gamma = params["ln_gamma"].astype(jnp.float32).reshape(1, D)
    beta = params["ln_beta"].astype(jnp.float32).reshape(1, D)

    # ---- K/V hoisted out of the kernel: computed once, fed pre-transposed.
    y_c = y.astype(cdt)
    wk_c = per_head_cols(wk).astype(cdt)
    wv_c = per_head_cols(wv).astype(cdt)
    k = (jnp.einsum('bsd,hdf->bhsf', y_c, wk_c,
                    preferred_element_type=jnp.float32)
         + bk.reshape(1, H, 1, dh))
    kt = jnp.transpose(k, (0, 1, 3, 2)).astype(cdt)       # (B, H, dh, Sk)
    v = (jnp.einsum('bsd,hdf->bhsf', y_c, wv_c,
                    preferred_element_type=jnp.float32)
         + bv.reshape(1, H, 1, dh)).astype(cdt)           # (B, H, Sk, dh)

    # ---------------- query-sequence tiling (dtype-aware, pads if needed)
    tq, Sq_pad = _pick_tq(Sq, block_q, cdt)
    x_in = x if Sq_pad == Sq else jnp.pad(x, ((0, 0), (0, Sq_pad - Sq), (0, 0)))
    nq = Sq_pad // tq

    sqz = pl.Squeezed()
    x_spec = pl.BlockSpec((sqz, tq, D), lambda b, qi, gi: (b, qi, 0))
    kt_spec = pl.BlockSpec((sqz, H, dh, Sk), lambda b, qi, gi: (b, 0, 0, 0))
    v_spec = pl.BlockSpec((sqz, H, Sk, dh), lambda b, qi, gi: (b, 0, 0, 0))
    # Constant index_map -> one-time DMA, resident for the whole kernel.
    wq_spec = pl.BlockSpec((nG, D, G * dh), lambda b, qi, gi: (0, 0, 0))
    bq_spec = pl.BlockSpec((nG, 1, G * dh), lambda b, qi, gi: (0, 0, 0))
    wo_spec = pl.BlockSpec((nG, G * dh, D), lambda b, qi, gi: (0, 0, 0))
    row_spec = pl.BlockSpec((1, D), lambda b, qi, gi: (0, 0))
    out_spec = pl.BlockSpec((sqz, tq, D), lambda b, qi, gi: (b, qi, 0))
    attn_spec = pl.BlockSpec((sqz, tq, Sk), lambda b, qi, gi: (b, qi, 0))

    if need_weights:
        out_shape = (jax.ShapeDtypeStruct((B, Sq_pad, D), x.dtype),
                     jax.ShapeDtypeStruct((B, Sq_pad, Sk), x.dtype))
        out_specs = [out_spec, attn_spec]
    else:
        out_shape = jax.ShapeDtypeStruct((B, Sq_pad, D), x.dtype)
        out_specs = out_spec

    kernel = functools.partial(_cross_attn_kernel, num_heads=H, group=G,
                               eps=eps, need_weights=need_weights)

    result = pl.pallas_call(
        kernel,
        out_shape=out_shape,
        grid_spec=pltpu.PrefetchScalarGridSpec(
            num_scalar_prefetch=0,
            grid=(B, nq, nG),                    # head-group (reduction) axis last
            in_specs=[x_spec, kt_spec, v_spec,
                      wq_spec, bq_spec,          # grouped Wq, bq (scale folded)
                      wo_spec, row_spec,         # grouped Wo, bo
                      row_spec, row_spec],       # LN gamma, beta
            out_specs=out_specs,
            scratch_shapes=[pltpu.VMEM((tq, D), x.dtype),        # xn (pre-LN)
                            pltpu.VMEM((tq, D), jnp.float32)]),  # out-proj accum
        compiler_params=pltpu.CompilerParams(
            dimension_semantics=("parallel", "parallel", "arbitrary"),
            vmem_limit_bytes=vmem_limit_bytes),
    )(x_in, kt, v, wq_g, bq_g, wo_g, bo, gamma, beta)

    if need_weights:
        out, attn = result
        return out[:, :Sq], attn[:, :Sq]
    return result[:, :Sq], None


def _reference(x, y, params, num_heads, eps=1e-5):
    """Pure-JAX reference mirroring torch.nn.MultiheadAttention + Pre-LN."""
    B, Sq, D = x.shape
    Sk = y.shape[1]
    H = num_heads
    dh = D // H
    mu = jnp.mean(x, -1, keepdims=True)
    var = jnp.mean((x - mu) ** 2, -1, keepdims=True)
    xn = (x - mu) / jnp.sqrt(var + eps) * params["ln_gamma"] + params["ln_beta"]
    wq, wk, wv = jnp.split(params["in_proj_weight"], 3, axis=0)
    bq, bk, bv = jnp.split(params["in_proj_bias"], 3)
    q = xn @ wq.T + bq
    k = y @ wk.T + bk
    v = y @ wv.T + bv
    q = q.reshape(B, Sq, H, dh).transpose(0, 2, 1, 3) / math.sqrt(dh)
    k = k.reshape(B, Sk, H, dh).transpose(0, 2, 1, 3)
    v = v.reshape(B, Sk, H, dh).transpose(0, 2, 1, 3)
    s = jnp.einsum("bhqd,bhkd->bhqk", q, k)
    p = jax.nn.softmax(s, axis=-1)
    ctx = jnp.einsum("bhqk,bhkd->bhqd", p, v).transpose(0, 2, 1, 3).reshape(B, Sq, D)
    o = ctx @ params["out_proj_weight"].T + params["out_proj_bias"]
    return x + o, p.mean(axis=1)


if __name__ == "__main__":
    B, Sq, Sk, D, H = 2, 8, 16, 32, 4

    key = jax.random.PRNGKey(0)
    ks = jax.random.split(key, 8)

    x = jax.random.normal(ks[0], (B, Sq, D), jnp.float32)
    y = jax.random.normal(ks[1], (B, Sk, D), jnp.float32)

    params = {
        "in_proj_weight": 0.1 * jax.random.normal(ks[2], (3 * D, D), jnp.float32),
        "in_proj_bias":   0.1 * jax.random.normal(ks[3], (3 * D,), jnp.float32),
        "out_proj_weight": 0.1 * jax.random.normal(ks[4], (D, D), jnp.float32),
        "out_proj_bias":  0.1 * jax.random.normal(ks[5], (D,), jnp.float32),
        "ln_gamma": jnp.ones((D,), jnp.float32)
                    + 0.05 * jax.random.normal(ks[6], (D,), jnp.float32),
        "ln_beta":  0.05 * jax.random.normal(ks[7], (D,), jnp.float32),
    }

    out, attn = cross_attention_layer(x, y, params, num_heads=H, need_weights=True)
    jax.block_until_ready((out, attn))

    ref_out, ref_attn = _reference(x, y, params, H)
    assert out.shape == (B, Sq, D) and attn.shape == (B, Sq, Sk)
    assert jnp.allclose(out, ref_out, atol=2e-3, rtol=2e-3), "output mismatch"
    assert jnp.allclose(attn, ref_attn, atol=1e-3, rtol=1e-3), "attn weights mismatch"
    assert jnp.allclose(jnp.sum(attn, axis=-1), 1.0, atol=1e-3), "attn rows not normalized"

    # need_weights=False path (skips the (Sq, Sk) HBM writeback entirely)
    out2, _ = cross_attention_layer(x, y, params, num_heads=H, need_weights=False)
    jax.block_until_ready(out2)
    assert jnp.allclose(out2, ref_out, atol=2e-3, rtol=2e-3), "need_weights=False mismatch"

    print("KERNEL_OK")
</pallas_src>

<mosaic_0001>
module attributes {stable_mosaic.version = 11 : i64} {
  func.func @_cross_attn_kernel(%arg0: i32, %arg1: i32, %arg2: i32, %arg3: memref<1x8x32xf32, #tpu.memory_space<vmem>>, %arg4: memref<1x4x8x16xf32, #tpu.memory_space<vmem>>, %arg5: memref<1x4x16x8xf32, #tpu.memory_space<vmem>>, %arg6: memref<1x32x32xf32, #tpu.memory_space<vmem>>, %arg7: memref<1x1x32xf32, #tpu.memory_space<vmem>>, %arg8: memref<1x32x32xf32, #tpu.memory_space<vmem>>, %arg9: memref<1x32xf32, #tpu.memory_space<vmem>>, %arg10: memref<1x32xf32, #tpu.memory_space<vmem>>, %arg11: memref<1x32xf32, #tpu.memory_space<vmem>>, %arg12: memref<1x8x32xf32, #tpu.memory_space<vmem>>, %arg13: memref<1x8x16xf32, #tpu.memory_space<vmem>>, %arg14: memref<8x32xf32, #tpu.memory_space<vmem>>, %arg15: memref<8x32xf32, #tpu.memory_space<vmem>>) attributes {dimension_semantics = [#tpu.dimension_semantics<parallel>, #tpu.dimension_semantics<parallel>, #tpu.dimension_semantics<arbitrary>], iteration_bounds = array<i64: 2, 1, 1>, scalar_prefetch = 0 : i64, scratch_operands = 2 : i64, tpu.core_type = #tpu.core_type<tc>, window_params = [{transform_indices = @transform_0, window_bounds = array<i64: 1, 8, 32>}, {transform_indices = @transform_1, window_bounds = array<i64: 1, 4, 8, 16>}, {transform_indices = @transform_2, window_bounds = array<i64: 1, 4, 16, 8>}, {pipeline_mode = #tpu.pipeline_mode<synchronous>, transform_indices = @transform_3, window_bounds = array<i64: 1, 32, 32>}, {pipeline_mode = #tpu.pipeline_mode<synchronous>, transform_indices = @transform_4, window_bounds = array<i64: 1, 1, 32>}, {pipeline_mode = #tpu.pipeline_mode<synchronous>, transform_indices = @transform_5, window_bounds = array<i64: 1, 32, 32>}, {pipeline_mode = #tpu.pipeline_mode<synchronous>, transform_indices = @transform_6, window_bounds = array<i64: 1, 32>}, {pipeline_mode = #tpu.pipeline_mode<synchronous>, transform_indices = @transform_7, window_bounds = array<i64: 1, 32>}, {pipeline_mode = #tpu.pipeline_mode<synchronous>, transform_indices = @transform_8, window_bounds = array<i64: 1, 32>}, {transform_indices = @transform_9, window_bounds = array<i64: 1, 8, 32>}, {transform_indices = @transform_10, window_bounds = array<i64: 1, 8, 16>}]} {
    %c0_i32 = arith.constant 0 : i32
    %0 = arith.cmpi eq, %arg2, %c0_i32 : i32
    %1 = arith.extui %0 : i1 to i32
    %c0_i32_0 = arith.constant 0 : i32
    %2 = arith.cmpi ne, %1, %c0_i32_0 : i32
    scf.if %2 {
      %c0_70 = arith.constant 0 : index
      %c0_71 = arith.constant 0 : index
      %c0_72 = arith.constant 0 : index
      %131 = vector.load %arg3[%c0_70, %c0_71, %c0_72] : memref<1x8x32xf32, #tpu.memory_space<vmem>>, vector<1x8x32xf32>
      %132 = vector.shape_cast %131 : vector<1x8x32xf32> to vector<8x32xf32>
      %cst_73 = arith.constant dense<0.000000e+00> : vector<8xf32>
      %133 = vector.multi_reduction <add>, %132, %cst_73 [1] : vector<8x32xf32> to vector<8xf32>
      %134 = vector.shape_cast %133 : vector<8xf32> to vector<8x1xf32>
      %cst_74 = arith.constant 3.200000e+01 : f32
      %135 = vector.broadcast %cst_74 : f32 to vector<8x1xf32>
      %136 = arith.divf %134, %135 : vector<8x1xf32>
      %137 = vector.broadcast %136 : vector<8x1xf32> to vector<8x32xf32>
      %138 = arith.subf %132, %137 : vector<8x32xf32>
      %139 = vector.broadcast %136 : vector<8x1xf32> to vector<8x32xf32>
      %140 = arith.subf %132, %139 : vector<8x32xf32>
      %141 = arith.mulf %138, %140 : vector<8x32xf32>
      %cst_75 = arith.constant dense<0.000000e+00> : vector<8xf32>
      %142 = vector.multi_reduction <add>, %141, %cst_75 [1] : vector<8x32xf32> to vector<8xf32>
      %143 = vector.shape_cast %142 : vector<8xf32> to vector<8x1xf32>
      %cst_76 = arith.constant 3.200000e+01 : f32
      %144 = vector.broadcast %cst_76 : f32 to vector<8x1xf32>
      %145 = arith.divf %143, %144 : vector<8x1xf32>
      %146 = vector.broadcast %136 : vector<8x1xf32> to vector<8x32xf32>
      %147 = arith.subf %132, %146 : vector<8x32xf32>
      %cst_77 = arith.constant 9.99999974E-6 : f32
      %148 = vector.broadcast %cst_77 : f32 to vector<8x1xf32>
      %149 = arith.addf %145, %148 : vector<8x1xf32>
      %150 = math.rsqrt %149 : vector<8x1xf32>
      %151 = vector.broadcast %150 : vector<8x1xf32> to vector<8x32xf32>
      %152 = arith.mulf %147, %151 : vector<8x32xf32>
      %c0_78 = arith.constant 0 : index
      %c0_79 = arith.constant 0 : index
      %153 = vector.load %arg10[%c0_78, %c0_79] : memref<1x32xf32, #tpu.memory_space<vmem>>, vector<1x32xf32>
      %154 = vector.broadcast %153 : vector<1x32xf32> to vector<8x32xf32>
      %155 = arith.mulf %152, %154 : vector<8x32xf32>
      %c0_80 = arith.constant 0 : index
      %c0_81 = arith.constant 0 : index
      %156 = vector.load %arg11[%c0_80, %c0_81] : memref<1x32xf32, #tpu.memory_space<vmem>>, vector<1x32xf32>
      %157 = vector.broadcast %156 : vector<1x32xf32> to vector<8x32xf32>
      %158 = arith.addf %155, %157 : vector<8x32xf32>
      %c0_82 = arith.constant 0 : index
      %c0_83 = arith.constant 0 : index
      %159 = vector.load %arg14[%c0_82, %c0_83] : memref<8x32xf32, #tpu.memory_space<vmem>>, vector<8x32xf32>
      tpu.vector_store %arg14[%c0_82, %c0_83], %158 {strides = array<i32>} : memref<8x32xf32, #tpu.memory_space<vmem>>, vector<8x32xf32>,
      %cst_84 = arith.constant 0.000000e+00 : f32
      %160 = vector.broadcast %cst_84 : f32 to vector<8x32xf32>
      %c0_85 = arith.constant 0 : index
      %c0_86 = arith.constant 0 : index
      %161 = vector.load %arg15[%c0_85, %c0_86] : memref<8x32xf32, #tpu.memory_space<vmem>>, vector<8x32xf32>
      tpu.vector_store %arg15[%c0_85, %c0_86], %160 {strides = array<i32>} : memref<8x32xf32, #tpu.memory_space<vmem>>, vector<8x32xf32>,
      %cst_87 = arith.constant 0.000000e+00 : f32
      %162 = vector.broadcast %cst_87 : f32 to vector<8x16xf32>
      %c0_88 = arith.constant 0 : index
      %c0_89 = arith.constant 0 : index
      %c0_90 = arith.constant 0 : index
      %163 = vector.load %arg13[%c0_88, %c0_89, %c0_90] : memref<1x8x16xf32, #tpu.memory_space<vmem>>, vector<1x8x16xf32>
      %164 = vector.shape_cast %163 : vector<1x8x16xf32> to vector<8x16xf32>
      %165 = vector.shape_cast %162 : vector<8x16xf32> to vector<1x8x16xf32>
      tpu.vector_store %arg13[%c0_88, %c0_89, %c0_90], %165 {strides = array<i32>} : memref<1x8x16xf32, #tpu.memory_space<vmem>>, vector<1x8x16xf32>,
    } else {
    }
    %c0 = arith.constant 0 : index
    %c0_1 = arith.constant 0 : index
    %3 = vector.load %arg14[%c0, %c0_1] : memref<8x32xf32, #tpu.memory_space<vmem>>, vector<8x32xf32>
    %4 = arith.index_cast %arg2 : i32 to index
    %c0_2 = arith.constant 0 : index
    %c0_3 = arith.constant 0 : index
    %5 = vector.load %arg6[%4, %c0_2, %c0_3] : memref<1x32x32xf32, #tpu.memory_space<vmem>>, vector<1x32x32xf32>
    %6 = vector.shape_cast %5 : vector<1x32x32xf32> to vector<32x32xf32>
    %cst = arith.constant dense<0.000000e+00> : vector<8x32xf32>
    %7 = tpu.matmul %3, %6, %cst {dimension_numbers = #tpu.dot_dimension_numbers<[1], [0], [0], [1], [0, 0, 1, 1], [], []>} : vector<8x32xf32>, vector<32x32xf32>, vector<8x32xf32> -> vector<8x32xf32>
    %8 = arith.index_cast %arg2 : i32 to index
    %c0_4 = arith.constant 0 : index
    %c0_5 = arith.constant 0 : index
    %9 = vector.load %arg7[%8, %c0_4, %c0_5] : memref<1x1x32xf32, #tpu.memory_space<vmem>>, vector<1x1x32xf32>
    %10 = vector.shape_cast %9 : vector<1x1x32xf32> to vector<1x32xf32>
    %11 = vector.broadcast %10 : vector<1x32xf32> to vector<8x32xf32>
    %12 = arith.addf %7, %11 : vector<8x32xf32>
    %c4_i32 = arith.constant 4 : i32
    %13 = arith.muli %arg2, %c4_i32 : i32
    %c0_i32_6 = arith.constant 0 : i32
    %14 = arith.addi %13, %c0_i32_6 : i32
    %15 = vector.extract_strided_slice %12 {offsets = [0, 0], sizes = [8, 8], strides = [1, 1]} : vector<8x32xf32> to vector<8x8xf32>
    %c0_7 = arith.constant 0 : index
    %16 = arith.index_cast %14 : i32 to index
    %c0_8 = arith.constant 0 : index
    %c0_9 = arith.constant 0 : index
    %17 = vector.load %arg4[%c0_7, %16, %c0_8, %c0_9] : memref<1x4x8x16xf32, #tpu.memory_space<vmem>>, vector<1x1x8x16xf32>
    %18 = vector.shape_cast %17 : vector<1x1x8x16xf32> to vector<8x16xf32>
    %cst_10 = arith.constant dense<0.000000e+00> : vector<8x16xf32>
    %19 = tpu.matmul %15, %18, %cst_10 {dimension_numbers = #tpu.dot_dimension_numbers<[1], [0], [0], [1], [0, 0, 1, 1], [], []>} : vector<8x8xf32>, vector<8x16xf32>, vector<8x16xf32> -> vector<8x16xf32>
    %cst_11 = arith.constant dense<0xFF800000> : vector<8xf32>
    %20 = vector.multi_reduction <maximumf>, %19, %cst_11 [1] : vector<8x16xf32> to vector<8xf32>
    %21 = vector.shape_cast %20 : vector<8xf32> to vector<8x1xf32>
    %22 = vector.broadcast %21 : vector<8x1xf32> to vector<8x16xf32>
    %23 = arith.subf %19, %22 : vector<8x16xf32>
    %24 = math.exp %23 : vector<8x16xf32>
    %cst_12 = arith.constant dense<0.000000e+00> : vector<8xf32>
    %25 = vector.multi_reduction <add>, %24, %cst_12 [1] : vector<8x16xf32> to vector<8xf32>
    %26 = vector.shape_cast %25 : vector<8xf32> to vector<8x1xf32>
    %cst_13 = arith.constant 1.000000e+00 : f32
    %27 = vector.broadcast %cst_13 : f32 to vector<8x1xf32>
    %28 = arith.divf %27, %26 : vector<8x1xf32>
    %c0_14 = arith.constant 0 : index
    %29 = arith.index_cast %14 : i32 to index
    %c0_15 = arith.constant 0 : index
    %c0_16 = arith.constant 0 : index
    %30 = vector.load %arg5[%c0_14, %29, %c0_15, %c0_16] : memref<1x4x16x8xf32, #tpu.memory_space<vmem>>, vector<1x1x16x8xf32>
    %31 = vector.shape_cast %30 : vector<1x1x16x8xf32> to vector<16x8xf32>
    %cst_17 = arith.constant dense<0.000000e+00> : vector<8x8xf32>
    %32 = tpu.matmul %24, %31, %cst_17 {dimension_numbers = #tpu.dot_dimension_numbers<[1], [0], [0], [1], [0, 0, 1, 1], [], []>} : vector<8x16xf32>, vector<16x8xf32>, vector<8x8xf32> -> vector<8x8xf32>
    %33 = vector.broadcast %28 : vector<8x1xf32> to vector<8x8xf32>
    %34 = arith.mulf %32, %33 : vector<8x8xf32>
    %35 = vector.broadcast %28 : vector<8x1xf32> to vector<8x16xf32>
    %36 = arith.mulf %24, %35 : vector<8x16xf32>
    %c4_i32_18 = arith.constant 4 : i32
    %37 = arith.muli %arg2, %c4_i32_18 : i32
    %c1_i32 = arith.constant 1 : i32
    %38 = arith.addi %37, %c1_i32 : i32
    %39 = vector.extract_strided_slice %12 {offsets = [0, 8], sizes = [8, 8], strides = [1, 1]} : vector<8x32xf32> to vector<8x8xf32>
    %c0_19 = arith.constant 0 : index
    %40 = arith.index_cast %38 : i32 to index
    %c0_20 = arith.constant 0 : index
    %c0_21 = arith.constant 0 : index
    %41 = vector.load %arg4[%c0_19, %40, %c0_20, %c0_21] : memref<1x4x8x16xf32, #tpu.memory_space<vmem>>, vector<1x1x8x16xf32>
    %42 = vector.shape_cast %41 : vector<1x1x8x16xf32> to vector<8x16xf32>
    %cst_22 = arith.constant dense<0.000000e+00> : vector<8x16xf32>
    %43 = tpu.matmul %39, %42, %cst_22 {dimension_numbers = #tpu.dot_dimension_numbers<[1], [0], [0], [1], [0, 0, 1, 1], [], []>} : vector<8x8xf32>, vector<8x16xf32>, vector<8x16xf32> -> vector<8x16xf32>
    %cst_23 = arith.constant dense<0xFF800000> : vector<8xf32>
    %44 = vector.multi_reduction <maximumf>, %43, %cst_23 [1] : vector<8x16xf32> to vector<8xf32>
    %45 = vector.shape_cast %44 : vector<8xf32> to vector<8x1xf32>
    %46 = vector.broadcast %45 : vector<8x1xf32> to vector<8x16xf32>
    %47 = arith.subf %43, %46 : vector<8x16xf32>
    %48 = math.exp %47 : vector<8x16xf32>
    %cst_24 = arith.constant dense<0.000000e+00> : vector<8xf32>
    %49 = vector.multi_reduction <add>, %48, %cst_24 [1] : vector<8x16xf32> to vector<8xf32>
    %50 = vector.shape_cast %49 : vector<8xf32> to vector<8x1xf32>
    %cst_25 = arith.constant 1.000000e+00 : f32
    %51 = vector.broadcast %cst_25 : f32 to vector<8x1xf32>
    %52 = arith.divf %51, %50 : vector<8x1xf32>
    %c0_26 = arith.constant 0 : index
    %53 = arith.index_cast %38 : i32 to index
    %c0_27 = arith.constant 0 : index
    %c0_28 = arith.constant 0 : index
    %54 = vector.load %arg5[%c0_26, %53, %c0_27, %c0_28] : memref<1x4x16x8xf32, #tpu.memory_space<vmem>>, vector<1x1x16x8xf32>
    %55 = vector.shape_cast %54 : vector<1x1x16x8xf32> to vector<16x8xf32>
    %cst_29 = arith.constant dense<0.000000e+00> : vector<8x8xf32>
    %56 = tpu.matmul %48, %55, %cst_29 {dimension_numbers = #tpu.dot_dimension_numbers<[1], [0], [0], [1], [0, 0, 1, 1], [], []>} : vector<8x16xf32>, vector<16x8xf32>, vector<8x8xf32> -> vector<8x8xf32>
    %57 = vector.broadcast %52 : vector<8x1xf32> to vector<8x8xf32>
    %58 = arith.mulf %56, %57 : vector<8x8xf32>
    %59 = vector.broadcast %52 : vector<8x1xf32> to vector<8x16xf32>
    %60 = arith.mulf %48, %59 : vector<8x16xf32>
    %61 = arith.addf %36, %60 : vector<8x16xf32>
    %c4_i32_30 = arith.constant 4 : i32
    %62 = arith.muli %arg2, %c4_i32_30 : i32
    %c2_i32 = arith.constant 2 : i32
    %63 = arith.addi %62, %c2_i32 : i32
    %64 = vector.extract_strided_slice %12 {offsets = [0, 16], sizes = [8, 8], strides = [1, 1]} : vector<8x32xf32> to vector<8x8xf32>
    %c0_31 = arith.constant 0 : index
    %65 = arith.index_cast %63 : i32 to index
    %c0_32 = arith.constant 0 : index
    %c0_33 = arith.constant 0 : index
    %66 = vector.load %arg4[%c0_31, %65, %c0_32, %c0_33] : memref<1x4x8x16xf32, #tpu.memory_space<vmem>>, vector<1x1x8x16xf32>
    %67 = vector.shape_cast %66 : vector<1x1x8x16xf32> to vector<8x16xf32>
    %cst_34 = arith.constant dense<0.000000e+00> : vector<8x16xf32>
    %68 = tpu.matmul %64, %67, %cst_34 {dimension_numbers = #tpu.dot_dimension_numbers<[1], [0], [0], [1], [0, 0, 1, 1], [], []>} : vector<8x8xf32>, vector<8x16xf32>, vector<8x16xf32> -> vector<8x16xf32>
    %cst_35 = arith.constant dense<0xFF800000> : vector<8xf32>
    %69 = vector.multi_reduction <maximumf>, %68, %cst_35 [1] : vector<8x16xf32> to vector<8xf32>
    %70 = vector.shape_cast %69 : vector<8xf32> to vector<8x1xf32>
    %71 = vector.broadcast %70 : vector<8x1xf32> to vector<8x16xf32>
    %72 = arith.subf %68, %71 : vector<8x16xf32>
    %73 = math.exp %72 : vector<8x16xf32>
    %cst_36 = arith.constant dense<0.000000e+00> : vector<8xf32>
    %74 = vector.multi_reduction <add>, %73, %cst_36 [1] : vector<8x16xf32> to vector<8xf32>
    %75 = vector.shape_cast %74 : vector<8xf32> to vector<8x1xf32>
    %cst_37 = arith.constant 1.000000e+00 : f32
    %76 = vector.broadcast %cst_37 : f32 to vector<8x1xf32>
    %77 = arith.divf %76, %75 : vector<8x1xf32>
    %c0_38 = arith.constant 0 : index
    %78 = arith.index_cast %63 : i32 to index
    %c0_39 = arith.constant 0 : index
    %c0_40 = arith.constant 0 : index
    %79 = vector.load %arg5[%c0_38, %78, %c0_39, %c0_40] : memref<1x4x16x8xf32, #tpu.memory_space<vmem>>, vector<1x1x16x8xf32>
    %80 = vector.shape_cast %79 : vector<1x1x16x8xf32> to vector<16x8xf32>
    %cst_41 = arith.constant dense<0.000000e+00> : vector<8x8xf32>
    %81 = tpu.matmul %73, %80, %cst_41 {dimension_numbers = #tpu.dot_dimension_numbers<[1], [0], [0], [1], [0, 0, 1, 1], [], []>} : vector<8x16xf32>, vector<16x8xf32>, vector<8x8xf32> -> vector<8x8xf32>
    %82 = vector.broadcast %77 : vector<8x1xf32> to vector<8x8xf32>
    %83 = arith.mulf %81, %82 : vector<8x8xf32>
    %84 = vector.broadcast %77 : vector<8x1xf32> to vector<8x16xf32>
    %85 = arith.mulf %73, %84 : vector<8x16xf32>
    %86 = arith.addf %61, %85 : vector<8x16xf32>
    %c4_i32_42 = arith.constant 4 : i32
    %87 = arith.muli %arg2, %c4_i32_42 : i32
    %c3_i32 = arith.constant 3 : i32
    %88 = arith.addi %87, %c3_i32 : i32
    %89 = vector.extract_strided_slice %12 {offsets = [0, 24], sizes = [8, 8], strides = [1, 1]} : vector<8x32xf32> to vector<8x8xf32>
    %c0_43 = arith.constant 0 : index
    %90 = arith.index_cast %88 : i32 to index
    %c0_44 = arith.constant 0 : index
    %c0_45 = arith.constant 0 : index
    %91 = vector.load %arg4[%c0_43, %90, %c0_44, %c0_45] : memref<1x4x8x16xf32, #tpu.memory_space<vmem>>, vector<1x1x8x16xf32>
    %92 = vector.shape_cast %91 : vector<1x1x8x16xf32> to vector<8x16xf32>
    %cst_46 = arith.constant dense<0.000000e+00> : vector<8x16xf32>
    %93 = tpu.matmul %89, %92, %cst_46 {dimension_numbers = #tpu.dot_dimension_numbers<[1], [0], [0], [1], [0, 0, 1, 1], [], []>} : vector<8x8xf32>, vector<8x16xf32>, vector<8x16xf32> -> vector<8x16xf32>
    %cst_47 = arith.constant dense<0xFF800000> : vector<8xf32>
    %94 = vector.multi_reduction <maximumf>, %93, %cst_47 [1] : vector<8x16xf32> to vector<8xf32>
    %95 = vector.shape_cast %94 : vector<8xf32> to vector<8x1xf32>
    %96 = vector.broadcast %95 : vector<8x1xf32> to vector<8x16xf32>
    %97 = arith.subf %93, %96 : vector<8x16xf32>
    %98 = math.exp %97 : vector<8x16xf32>
    %cst_48 = arith.constant dense<0.000000e+00> : vector<8xf32>
    %99 = vector.multi_reduction <add>, %98, %cst_48 [1] : vector<8x16xf32> to vector<8xf32>
    %100 = vector.shape_cast %99 : vector<8xf32> to vector<8x1xf32>
    %cst_49 = arith.constant 1.000000e+00 : f32
    %101 = vector.broadcast %cst_49 : f32 to vector<8x1xf32>
    %102 = arith.divf %101, %100 : vector<8x1xf32>
    %c0_50 = arith.constant 0 : index
    %103 = arith.index_cast %88 : i32 to index
    %c0_51 = arith.constant 0 : index
    %c0_52 = arith.constant 0 : index
    %104 = vector.load %arg5[%c0_50, %103, %c0_51, %c0_52] : memref<1x4x16x8xf32, #tpu.memory_space<vmem>>, vector<1x1x16x8xf32>
    %105 = vector.shape_cast %104 : vector<1x1x16x8xf32> to vector<16x8xf32>
    %cst_53 = arith.constant dense<0.000000e+00> : vector<8x8xf32>
    %106 = tpu.matmul %98, %105, %cst_53 {dimension_numbers = #tpu.dot_dimension_numbers<[1], [0], [0], [1], [0, 0, 1, 1], [], []>} : vector<8x16xf32>, vector<16x8xf32>, vector<8x8xf32> -> vector<8x8xf32>
    %107 = vector.broadcast %102 : vector<8x1xf32> to vector<8x8xf32>
    %108 = arith.mulf %106, %107 : vector<8x8xf32>
    %109 = vector.broadcast %102 : vector<8x1xf32> to vector<8x16xf32>
    %110 = arith.mulf %98, %109 : vector<8x16xf32>
    %111 = arith.addf %86, %110 : vector<8x16xf32>
    %112 = tpu.concatenate %34, %58, %83, %108 in 1 : vector<8x8xf32>, vector<8x8xf32>, vector<8x8xf32>, vector<8x8xf32> -> vector<8x32xf32>
    %c0_54 = arith.constant 0 : index
    %c0_55 = arith.constant 0 : index
    %113 = vector.load %arg15[%c0_54, %c0_55] : memref<8x32xf32, #tpu.memory_space<vmem>>, vector<8x32xf32>
    %114 = arith.index_cast %arg2 : i32 to index
    %c0_56 = arith.constant 0 : index
    %c0_57 = arith.constant 0 : index
    %115 = vector.load %arg8[%114, %c0_56, %c0_57] : memref<1x32x32xf32, #tpu.memory_space<vmem>>, vector<1x32x32xf32>
    %116 = vector.shape_cast %115 : vector<1x32x32xf32> to vector<32x32xf32>
    %cst_58 = arith.constant dense<0.000000e+00> : vector<8x32xf32>
    %117 = tpu.matmul %112, %116, %cst_58 {dimension_numbers = #tpu.dot_dimension_numbers<[1], [0], [0], [1], [0, 0, 1, 1], [], []>} : vector<8x32xf32>, vector<32x32xf32>, vector<8x32xf32> -> vector<8x32xf32>
    %118 = arith.addf %113, %117 : vector<8x32xf32>
    %c0_59 = arith.constant 0 : index
    %c0_60 = arith.constant 0 : index
    %119 = vector.load %arg15[%c0_59, %c0_60] : memref<8x32xf32, #tpu.memory_space<vmem>>, vector<8x32xf32>
    tpu.vector_store %arg15[%c0_59, %c0_60], %118 {strides = array<i32>} : memref<8x32xf32, #tpu.memory_space<vmem>>, vector<8x32xf32>,
    %c0_61 = arith.constant 0 : index
    %c0_62 = arith.constant 0 : index
    %c0_63 = arith.constant 0 : index
    %120 = vector.load %arg13[%c0_61, %c0_62, %c0_63] : memref<1x8x16xf32, #tpu.memory_space<vmem>>, vector<1x8x16xf32>
    %121 = vector.shape_cast %120 : vector<1x8x16xf32> to vector<8x16xf32>
    %cst_64 = arith.constant 2.500000e-01 : f32
    %122 = vector.broadcast %cst_64 : f32 to vector<8x16xf32>
    %123 = arith.mulf %111, %122 : vector<8x16xf32>
    %124 = arith.addf %121, %123 : vector<8x16xf32>
    %c0_65 = arith.constant 0 : index
    %c0_66 = arith.constant 0 : index
    %c0_67 = arith.constant 0 : index
    %125 = vector.load %arg13[%c0_65, %c0_66, %c0_67] : memref<1x8x16xf32, #tpu.memory_space<vmem>>, vector<1x8x16xf32>
    %126 = vector.shape_cast %125 : vector<1x8x16xf32> to vector<8x16xf32>
    %127 = vector.shape_cast %124 : vector<8x16xf32> to vector<1x8x16xf32>
    tpu.vector_store %arg13[%c0_65, %c0_66, %c0_67], %127 {strides = array<i32>} : memref<1x8x16xf32, #tpu.memory_space<vmem>>, vector<1x8x16xf32>,
    %c0_i32_68 = arith.constant 0 : i32
    %128 = arith.cmpi eq, %arg2, %c0_i32_68 : i32
    %129 = arith.extui %128 : i1 to i32
    %c0_i32_69 = arith.constant 0 : i32
    %130 = arith.cmpi ne, %129, %c0_i32_69 : i32
    scf.if %130 {
      %c0_70 = arith.constant 0 : index
      %c0_71 = arith.constant 0 : index
      %131 = vector.load %arg15[%c0_70, %c0_71] : memref<8x32xf32, #tpu.memory_space<vmem>>, vector<8x32xf32>
      %c0_72 = arith.constant 0 : index
      %c0_73 = arith.constant 0 : index
      %132 = vector.load %arg9[%c0_72, %c0_73] : memref<1x32xf32, #tpu.memory_space<vmem>>, vector<1x32xf32>
      %133 = vector.broadcast %132 : vector<1x32xf32> to vector<8x32xf32>
      %134 = arith.addf %131, %133 : vector<8x32xf32>
      %c0_74 = arith.constant 0 : index
      %c0_75 = arith.constant 0 : index
      %c0_76 = arith.constant 0 : index
      %135 = vector.load %arg3[%c0_74, %c0_75, %c0_76] : memref<1x8x32xf32, #tpu.memory_space<vmem>>, vector<1x8x32xf32>
      %136 = vector.shape_cast %135 : vector<1x8x32xf32> to vector<8x32xf32>
      %137 = arith.addf %136, %134 : vector<8x32xf32>
      %c0_77 = arith.constant 0 : index
      %c0_78 = arith.constant 0 : index
      %c0_79 = arith.constant 0 : index
      %138 = vector.load %arg12[%c0_77, %c0_78, %c0_79] : memref<1x8x32xf32, #tpu.memory_space<vmem>>, vector<1x8x32xf32>
      %139 = vector.shape_cast %138 : vector<1x8x32xf32> to vector<8x32xf32>
      %140 = vector.shape_cast %137 : vector<8x32xf32> to vector<1x8x32xf32>
      tpu.vector_store %arg12[%c0_77, %c0_78, %c0_79], %140 {strides = array<i32>} : memref<1x8x32xf32, #tpu.memory_space<vmem>>, vector<1x8x32xf32>,
    } else {
    }
    return
  }
  func.func @transform_0(%arg0: i32, %arg1: i32, %arg2: i32) -> (i32, i32, i32) {
    %c0_i32 = arith.constant 0 : i32
    %c0_i32_0 = arith.constant 0 : i32
    return %arg0, %arg1, %c0_i32 : i32, i32, i32
  }
  func.func @transform_1(%arg0: i32, %arg1: i32, %arg2: i32) -> (i32, i32, i32, i32) {
    %c0_i32 = arith.constant 0 : i32
    %c0_i32_0 = arith.constant 0 : i32
    %c0_i32_1 = arith.constant 0 : i32
    %c0_i32_2 = arith.constant 0 : i32
    return %arg0, %c0_i32, %c0_i32_0, %c0_i32_1 : i32, i32, i32, i32
  }
  func.func @transform_2(%arg0: i32, %arg1: i32, %arg2: i32) -> (i32, i32, i32, i32) {
    %c0_i32 = arith.constant 0 : i32
    %c0_i32_0 = arith.constant 0 : i32
    %c0_i32_1 = arith.constant 0 : i32
    %c0_i32_2 = arith.constant 0 : i32
    return %arg0, %c0_i32, %c0_i32_0, %c0_i32_1 : i32, i32, i32, i32
  }
  func.func @transform_3(%arg0: i32, %arg1: i32, %arg2: i32) -> (i32, i32, i32) {
    %c0_i32 = arith.constant 0 : i32
    %c0_i32_0 = arith.constant 0 : i32
    %c0_i32_1 = arith.constant 0 : i32
    %c0_i32_2 = arith.constant 0 : i32
    return %c0_i32, %c0_i32_0, %c0_i32_1 : i32, i32, i32
  }
  func.func @transform_4(%arg0: i32, %arg1: i32, %arg2: i32) -> (i32, i32, i32) {
    %c0_i32 = arith.constant 0 : i32
    %c0_i32_0 = arith.constant 0 : i32
    %c0_i32_1 = arith.constant 0 : i32
    %c0_i32_2 = arith.constant 0 : i32
    return %c0_i32, %c0_i32_0, %c0_i32_1 : i32, i32, i32
  }
  func.func @transform_5(%arg0: i32, %arg1: i32, %arg2: i32) -> (i32, i32, i32) {
    %c0_i32 = arith.constant 0 : i32
    %c0_i32_0 = arith.constant 0 : i32
    %c0_i32_1 = arith.constant 0 : i32
    %c0_i32_2 = arith.constant 0 : i32
    return %c0_i32, %c0_i32_0, %c0_i32_1 : i32, i32, i32
  }
  func.func @transform_6(%arg0: i32, %arg1: i32, %arg2: i32) -> (i32, i32) {
    %c0_i32 = arith.constant 0 : i32
    %c0_i32_0 = arith.constant 0 : i32
    %c0_i32_1 = arith.constant 0 : i32
    return %c0_i32, %c0_i32_0 : i32, i32
  }
  func.func @transform_7(%arg0: i32, %arg1: i32, %arg2: i32) -> (i32, i32) {
    %c0_i32 = arith.constant 0 : i32
    %c0_i32_0 = arith.constant 0 : i32
    %c0_i32_1 = arith.constant 0 : i32
    return %c0_i32, %c0_i32_0 : i32, i32
  }
  func.func @transform_8(%arg0: i32, %arg1: i32, %arg2: i32) -> (i32, i32) {
    %c0_i32 = arith.constant 0 : i32
    %c0_i32_0 = arith.constant 0 : i32
    %c0_i32_1 = arith.constant 0 : i32
    return %c0_i32, %c0_i32_0 : i32, i32
  }
  func.func @transform_9(%arg0: i32, %arg1: i32, %arg2: i32) -> (i32, i32, i32) {
    %c0_i32 = arith.constant 0 : i32
    %c0_i32_0 = arith.constant 0 : i32
    return %arg0, %arg1, %c0_i32 : i32, i32, i32
  }
  func.func @transform_10(%arg0: i32, %arg1: i32, %arg2: i32) -> (i32, i32, i32) {
    %c0_i32 = arith.constant 0 : i32
    %c0_i32_0 = arith.constant 0 : i32
    return %arg0, %arg1, %c0_i32 : i32, i32, i32
  }
}

</mosaic_0001>

<bundles_post_ra>
// kernel: tpu_custom_call.1
= control target key start
LH: loop header
LB: loop body
LE: loop exit
PB: predicated region body
PF: predicated region fallthrough
CT: control target
= control target key end

     0   :  { %s1668_s0 = inlined_call_operand.vmem [shape: f32[2,8,32], index: 0, kind: input, shape index: {}]   ;;  %s1669_s1 = inlined_call_operand.vmem [shape: f32[2,4,8,16], index: 1, kind: input, shape index: {}]   ;;  %s1670_s2 = inlined_call_operand.vmem [shape: f32[2,4,16,8], index: 2, kind: input, shape index: {}]   ;;  %s1671_s3 = inlined_call_operand.vmem [shape: f32[1,32,32], index: 3, kind: input, shape index: {}]   ;;  %s1672_s4 = inlined_call_operand.vmem [shape: f32[1,1,32], index: 4, kind: input, shape index: {}]   ;;  %s1673_s5 = inlined_call_operand.vmem [shape: f32[1,32,32], index: 5, kind: input, shape index: {}]   ;;  %s1674_s6 = inlined_call_operand.vmem [shape: f32[1,32], index: 6, kind: input, shape index: {}]   ;;  %s1675_s7 = inlined_call_operand.vmem [shape: f32[1,32], index: 7, kind: input, shape index: {}]   ;;  %s1676_s8 = inlined_call_operand.vmem [shape: f32[1,32], index: 8, kind: input, shape index: {}]   ;;  %s1677_s9 = inlined_call_operand.hbm [shape: f32[2,8,32], index: 9, kind: output, shape index: {0}]   ;;  %s1678_s10 = inlined_call_operand.hbm [shape: f32[2,8,16], index: 10, kind: output, shape index: {1}]  }
   0x1   :  { %1680 = sst [smem:[#allocation10_spill]] %s1668_s0 }
   0x2   :  { %1681 = sst [smem:[#allocation11_spill]] %s1669_s1 }
   0x3   :  { %1682 = sst [smem:[#allocation12_spill]] %s1670_s2 }
   0x4   :  { %1683 = sst [smem:[#allocation13_spill]] %s1671_s3 }
   0x5   :  { %1684 = sst [smem:[#allocation14_spill]] %s1672_s4 }
   0x6   :  { %16 = vsyncpa [#allocation5], 0 }
   0x7   :  { %18 = vsyncpa [#allocation5 + $0x1], 0 }
   0x8   :  { %19 = vsyncpa [#allocation7], 0 }
   0x9   :  { %21 = vsyncpa [#allocation7 + $0x1], 0  ;;  %s1424_s13 = smov 0   ;;  %s1426_s14 = smov 0  }
   0xa   :  { %s1428_s15 = smov 0   ;;  %s1430_s16 = smov 0  }
   0xb   :  { %s1432_s17 = smov 0   ;;  %s1434_s18 = smov 0  }
   0xc LB: > { %s1118_s19 = sadd.s32 4294967295, %s1359_s18   ;;  %s1119_s20 = sadd.s32 4294967294, %s1359_s18   ;;  %s1359_s18 = sphi %s1434_s18, %s27_s18   ;;  %s1355_s17 = sphi %s1432_s17, %s1699_s17   ;;  %s1351_s16 = sphi %s1430_s16, %s1698_s16   ;;  %s1347_s15 = sphi %s1428_s15, %s1697_s15   ;;  %s1343_s14 = sphi %s1426_s14, %s1696_s14   ;;  %s1339_s13 = sphi %s1424_s13, %s1695_s13  }
   0xd   : > { %s46_s21 = sadd.s32 1, %s1355_s17  ;;  %s261_s22 = sadd.s32 1, %s1347_s15 }
   0xe   : > { %p48_p0 = scmp.ge.s32.totalorder %s46_s21, 2  ;;  %p271_p1 = scmp.ne.s32.totalorder %s1347_s15, %s1343_s14 }
   0xf   : > { %p272_p2 = scmp.eq.s32.totalorder %s1118_s19, 1  ;;  %p277_p3 = scmp.ne.s32.totalorder %s1343_s14, %s1339_s13 }
  0x10   : > { %s1701_s21 = smov (%p48_p0, %s46_s21), 0  ;;  %p278_p5 = scmp.eq.s32.totalorder %s1119_s20, 1 }
  0x11   : > { %p1464_p4 = por %p272_p2, %p271_p1  ;;  %s256_s24 = ssub.s32 %s1355_s17, %s1701_s21 }
  0x12   : > { %p1122_p6 = scmp.ge.s32.totalorder %s1359_s18, 1  ;;  %p259_p7 = scmp.eq.s32.totalorder %s256_s24, 0 }
  0x13   : > { %p1471_p8 = por %p278_p5, %p277_p3  ;;  %p368_p9 = scmp.lt.s32.totalorder %s1359_s18, 3 }
  0x14   : > { %s1477_s26 = scalar_select %p259_p7, %s1347_s15, %s261_s22  }
  0x15   : > { %p369_p10 = pnand %p1122_p6, %p368_p9 }
  0x16   : > { %p423_p11 = scmp.lt.s32.totalorder (!%p369_p10), %s1351_s16, 1  ;;  %s1687_s0 = sld [smem:[#allocation10_spill]] (!%p369_p10) }
  0x17   : > { %372 = sbr.rel (%p369_p10) target bundleno = 1230 (0x4ce), region = 56  ;;  %s1688_s3 = sld [smem:[#allocation13_spill]] (!%p369_p10) }
  0x18   : > { %s1689_s1 = sld [smem:[#allocation11_spill]] (!%p369_p10)  ;;  %s1362_s12 = smov (!%p369_p10), 104  }
  0x19   : > { %s1690_s4 = sld [smem:[#allocation14_spill]] (!%p369_p10)  ;;  %s1363_s19 = smov (!%p369_p10), 120  }
  0x1a   : > { %s1364_s20 = smov (!%p369_p10), 112   ;;  %s1691_s2 = sld [smem:[#allocation12_spill]] (!%p369_p10) }
  0x1c   : > { %s1481_s27 = scalar_select %p423_p11, %s1351_s16, 1  ;;  %vm445_vm0 = vcmask 261120   ;;  %v1361_v2 = vmov 32.0   ;;  %v1225_v27 = vld [vmem:[%s1675_s7] ss:$0 sm:$0xff]  ;;  %vm529_vm5 = vcmask 64512  }
  0x1d   : > { %1229 = vrcp.f32 %v1361_v2  ;;  %v495_v14 = vld [vmem:[%s1688_s3 + $0x18] sm:$0xff]  ;;  %v494_v15 = vld [vmem:[%s1688_s3 + $0x10] sm:$0xff]  ;;  %v493_v16 = vld [vmem:[%s1688_s3 + $0x8] sm:$0xff]  ;;  %vm487_vm6 = vcmask 130048  }
  0x1e   : > { %s1125_s28 = sshll.u32 %s1481_s27, 3  ;;  %517 = vmatpush.msra.mxu0 %v495_v14  ;;  %v492_v19 = vld [vmem:[%s1688_s3] sm:$0xff]  ;;  %s1155_s22 = sshll.u32 %s1481_s27, 5 }
  0x1f   : > { %s429_s11 = scalar_lea.vmem %s1687_s0, %s1125_s28  ;;  %v1226_v29 = vld [vmem:[%s1676_s8] ss:$0 sm:$0xff]  ;;  %s434_s29 = scalar_lea.vmem %s1689_s1, %s1155_s22 }
  0x20   : > { %v1487_v0 = vld [vmem:[%s429_s11] sm:$0xff]  ;;  %518 = vmatpush.msra.mxu0 %v494_v15  ;;  %v1143_v35 = vld [vmem:[%s434_s29 + $0x18] sm:$0xff]  ;;  %v1133_v39 = vld [vmem:[%s434_s29 + $0x8] sm:$0xff]  ;;  %s1156_s22 = sshll.u32 %s1481_s27, 6  ;;  %s1567_s27 = sand.u32 1, %s1343_s14  }
  0x21   : > { %v446_v1 = vsel %vm445_vm0, %v1487_v0, 0.0  ;;  %v528_v34 = vld [vmem:[%s434_s29] sm:$0xff]  ;;  %630 = vmatpush.msra.mxu3 %v1133_v39  ;;  %v1138_v40 = vld [vmem:[%s434_s29 + $0x10] sm:$0xff]  ;;  %s1529_s29 = scalar_lea.vmem %s1691_s2, %s1156_s22  ;;  %s1679_s30 = sshll.u32 %s1567_s27, 3 }
  0x22   : > { %447 = vadd.xlane.f32.xlu0 %v446_v1  ;;  %519 = vmatpush.msra.mxu0 %v493_v16  ;;  %v1227_v36 = vld [vmem:[%s1690_s4] ss:$0 sm:$0xff]  ;;  %v581_v46 = vld [vmem:[%s1529_s29 + $0x8] sm:$0xff]  ;;  %v1136_v59 = vld [vmem:[%s1529_s29 + $0x18] sm:$0xff]  ;;  %s1573_s11 = scalar_lea.vmem [#allocation6], %s1679_s30  ;;  %s1151_s22 = sshll.u32 %s1351_s16, 3 }
  0x23   : > { %v1230_v3 = vpop.eup %1229  ;;  %548 = vmatpush.msra.mxu1 %v528_v34  ;;  %712 = vmatpush.msrb.mxu3 %v1138_v40  ;;  %v580_v47 = vld [vmem:[%s1529_s29] sm:$0xff]  ;;  %v1135_v60 = vld [vmem:[%s1529_s29 + $0x10] sm:$0xff]  ;;  %v1141_v61 = vld [vmem:[%s1529_s29 + $0x28] sm:$0xff]  ;;  %s948_s28 = scalar_lea.hbm %s1678_s10, %s1151_s22  ;;  %s1269_s16 = scalar_lea.hbm %s1678_s10, 16 }
  0x24   : > { %v450_v4 = vmul.f32 32.0, %v1230_v3  ;;  %vm454_vm1 = vweird.f32 %v1230_v3  ;;  %520 = vmatpush.msra.mxu0 %v492_v19  ;;  %599 = vmatpush.msra.mxu2 %v581_v46  ;;  %v1146_v62 = vld [vmem:[%s1529_s29 + $0x38] sm:$0xff]  ;;  %v1140_v63 = vld [vmem:[%s1529_s29 + $0x20] sm:$0xff]  ;;  %v1145_v1 = vld [vmem:[%s1529_s29 + $0x30] sm:$0xff]  ;;  %v1365_v19 = vmov 0.0   ;;  %s950_s29 = sshll.u32 %s1573_s11, 4  ;;  %s951_s29 = int_to_ptr.vmem [resolvable:$true] %s950_s29 }
  0x25   : > { %680 = vmatpush.msrb.mxu1 %v1136_v59  ;;  %486 = vst.msk [vmem:[#allocation3] sm:$0xff] %vm445_vm0, %v1365_v19 }
  0x26   : > { %v451_v5 = vsub.f32 1.0, %v450_v4  ;;  %794 = vmatpush.msrb.mxu0 %v1143_v35  ;;  %600 = vmatpush.msra.mxu2 %v580_v47  ;;  %488 = vst.msk [vmem:[%s1573_s11] sm:$0xff] %vm487_vm6, %v1365_v19  ;;  %v873_v19 = vld [vmem:[%s1673_s5 + $0x10] sm:$0xff] }
  0x27   : > { %681 = vmatpush.msrb.mxu1 %v1135_v60 }
  0x28   : > { %v452_v6 = vmul.f32 %v1230_v3, %v451_v5  ;;  %762 = vmatpush.msrb.mxu2 %v1141_v61 }
  0x2a   : > { %v453_v7 = vadd.f32 %v1230_v3, %v452_v6  ;;  %763 = vmatpush.msrb.mxu2 %v1140_v63 }
  0x2c   : > { %v455_v8 = vsel %vm454_vm1, %v1230_v3, %v453_v7 }
  0x95   : > { %v448_v9 = vpop.xlane.xlu0 %447 }
  0x96   : > { %v456_v10 = vmul.f32 %v455_v8, %v448_v9 }
  0x98   : > { %v457_v11 = vsub.f32 %v1487_v0, %v456_v10 }
  0x9a   : > { %v458_v12 = vmul.f32 %v457_v11, %v457_v11 }
  0x9c   : > { %v459_v13 = vsel %vm445_vm0, %v458_v12, 0.0 }
  0x9d   : > { %460 = vadd.xlane.f32.xlu0 %v459_v13 }
 0x110   : > { %v461_v17 = vpop.xlane.xlu0 %460 }
 0x111   : > { %v462_v18 = vmul.f32 %v461_v17, %v455_v8 }
 0x113   : > { %v463_v20 = vadd.f32 1e-05, %v462_v18 }
 0x115   : > { %1231 = vrsqrt.f32 %v463_v20  ;;  %vm470_vm3 = vweird.f32 %v463_v20 }
 0x11b   : > { %v1232_v21 = vpop.eup %1231 }
 0x11c   : > { %v465_v22 = vmul.f32 %v1232_v21, %v463_v20  ;;  %vm471_vm2 = vweird.f32 %v1232_v21 }
 0x11d   : > { %vm472_vm4 = vmor %vm470_vm3, %vm471_vm2 }
 0x11e   : > { %v466_v23 = vmul.f32 %v1232_v21, %v465_v22 }
 0x120   : > { %v467_v24 = vmul.f32 0.5, %v466_v23 }
 0x122   : > { %v468_v25 = vsub.f32 1.5, %v467_v24 }
 0x124   : > { %v469_v26 = vmul.f32 %v1232_v21, %v468_v25 }
 0x126   : > { %v473_v28 = vsel %vm472_vm4, %v1232_v21, %v469_v26 }
 0x127   : > { %v474_v30 = vmul.f32 %v473_v28, %v457_v11 }
 0x129   : > { %v479_v31 = vmul.f32 %v1225_v27, %v474_v30 }
 0x12b   : > { %v484_v32 = vadd.f32 %v1226_v29, %v479_v31 }
 0x12d   : > { %485 = vst.msk [vmem:[#allocation2] sm:$0xff] %vm445_vm0, %v484_v32 }
 0x134   : > { %v489_v33 = vld [vmem:[#allocation2] sm:$0xff] }
 0x135   : > { %1130 = vmatmul.msk.f32.vlgmr.msra.gmra.mxu0 %vm445_vm0, %v489_v33 }
 0x1b2   : > { %v522_v37 = vpop.f32.mrf.mxu0 }
 0x1b3   : > { %v523_v38 = vadd.f32 %v1227_v36, %v522_v37 }
 0x1b5   : > { %775 = vrot.lane.b32.xlu2 %v523_v38, %s1362_s12  ;;  %611 = vrot.lane.b32.xlu1 %v523_v38, %s1363_s19  ;;  %s1366_s12 = smov 8   ;;  %s1367_s19 = smov 16  }
 0x1b6   : > { %1131 = vmatmul.msk.f32.vlgmr.msra.gmra.mxu1 %vm529_vm5, %v523_v38 }
 0x1b7   : > { %844 = vmatpush.msra.mxu1 %v1146_v62 }
 0x1b9   : > { %845 = vmatpush.msra.mxu1 %v1145_v1 }
 0x1bd   : > { %693 = vrot.lane.b32.xlu1 %v523_v38, %s1364_s20  ;;  %s1368_s20 = smov 24  }
 0x20f   : > { %v776_v41 = vpop.permute.xlu2 %775 }
 0x210   : > { %1144 = vmatmul.msk.f32.vlgmr.msrb.gmra.mxu0 %vm529_vm5, %v776_v41 }
 0x227   : > { %v612_v42 = vpop.permute.xlu1 %611 }
 0x228   : > { %1134 = vmatmul.msk.f32.vlgmr.msra.gmra.mxu3 %vm529_vm5, %v612_v42 }
 0x22f   : > { %v694_v43 = vpop.permute.xlu1 %693 }
 0x230   : > { %1139 = vmatmul.msk.f32.vlgmr.msrb.gmra.mxu3 %vm529_vm5, %v694_v43 }
 0x233   : > { %v550_v44 = vpop.f32.mrf.mxu1 }
 0x234   : > { %v554_v45 = vsel %vm487_vm6, %v550_v44, -inf }
 0x235   : > { %555 = vmax.xlane.f32.xlu2 %v554_v45 }
 0x28d   : > { %v796_v53 = vpop.f32.mrf.mxu0 }
 0x28e   : > { %v799_v57 = vsel %vm487_vm6, %v796_v53, -inf }
 0x2a8   : > { %v556_v48 = vpop.xlane.xlu2 %555 }
 0x2a9   : > { %v557_v49 = vsub.f32 %v550_v44, %v556_v48 }
 0x2ab   : > { %v558_v50 = vmul.f32 1.442695, %v557_v49  ;;  %v632_v51 = vpop.f32.mrf.mxu3 }
 0x2ac   : > { %v635_v52 = vsel %vm487_vm6, %v632_v51, -inf }
 0x2ad   : > { %1233 = vpow2.f32 %v558_v50  ;;  %636 = vmax.xlane.f32.xlu0 %v635_v52 }
 0x2b3   : > { %v1534_v54 = vpop.eup %1233  ;;  %v714_v55 = vpop.f32.mrf.mxu3 }
 0x2b4   : > { %1132 = vmatmul.msk.f32.vlgmr.msra.gmra.mxu2 %vm487_vm6, %v1534_v54  ;;  %v560_v56 = vsel %vm487_vm6, %v1534_v54, 0.0  ;;  %v717_v58 = vsel %vm487_vm6, %v714_v55, -inf }
 0x2b5   : > { %561 = vadd.xlane.f32.xlu2 %v560_v56  ;;  %800 = vmax.xlane.f32.xlu0 %v799_v57 }
 0x2b6   : > { %718 = vmax.xlane.f32.xlu1 %v717_v58 }
 0x320   : > { %v637_v2 = vpop.xlane.xlu0 %636 }
 0x321   : > { %v638_v3 = vsub.f32 %v632_v51, %v637_v2 }
 0x323   : > { %v639_v4 = vmul.f32 1.442695, %v638_v3 }
 0x325   : > { %1235 = vpow2.f32 %v639_v4 }
 0x328   : > { %v801_v5 = vpop.xlane.xlu0 %800  ;;  %v562_v17 = vpop.xlane.xlu2 %561 }
 0x329   : > { %v802_v6 = vsub.f32 %v796_v53, %v801_v5  ;;  %v719_v7 = vpop.xlane.xlu1 %718  ;;  %vm568_vm13 = vweird.f32 %v562_v17  ;;  %v574_v46 = vand.u32 2147483648, %v562_v17  ;;  %v572_v48 = vand.u32 2147483647, %v562_v17 }
 0x32a   : > { %v720_v8 = vsub.f32 %v714_v55, %v719_v7 }
 0x32b   : > { %v1548_v9 = vpop.eup %1235  ;;  %v803_v10 = vmul.f32 1.442695, %v802_v6  ;;  %v575_v56 = vor.u32 1.1754944e-38, %v574_v46  ;;  %vm573_vm3 = vcmp.eq.f32.partialorder %v572_v48, 8.507059e+37 }
 0x32c   : > { %v721_v11 = vmul.f32 1.442695, %v720_v8  ;;  %1137 = vmatmul.msk.f32.vlgmr.msrb.gmra.mxu1 %vm487_vm6, %v1548_v9  ;;  %v641_v12 = vsel %vm487_vm6, %v1548_v9, 0.0 }
 0x32d   : > { %1237 = vpow2.f32 %v803_v10  ;;  %642 = vadd.xlane.f32.xlu0 %v641_v12 }
 0x32e   : > { %1239 = vpow2.f32 %v721_v11 }
 0x32f   : > { %1241 = vrcp.f32 %v562_v17 }
 0x333   : > { %v1554_v13 = vpop.eup %1237 }
 0x334   : > { %v1556_v14 = vpop.eup %1239  ;;  %1147 = vmatmul.msk.f32.vlgmr.msra.gmra.mxu1 %vm487_vm6, %v1554_v13  ;;  %v805_v16 = vsel %vm487_vm6, %v1554_v13, 0.0 }
 0x335   : > { %1142 = vmatmul.msk.f32.vlgmr.msrb.gmra.mxu2 %vm487_vm6, %v1556_v14  ;;  %v723_v15 = vsel %vm487_vm6, %v1556_v14, 0.0  ;;  %v1242_v20 = vpop.eup %1241 }
 0x336   : > { %724 = vadd.xlane.f32.xlu0 %v723_v15  ;;  %v564_v23 = vmul.f32 %v1242_v20, %v562_v17  ;;  %vm569_vm11 = vweird.f32 %v1242_v20 }
 0x337   : > { %v1577_v39 = vpop.f32.mrf.mxu2  ;;  %vm1579_vm14 = vmor %vm568_vm13, %vm569_vm11 }
 0x338   : > { %v565_v29 = vsub.f32 1.0, %v564_v23 }
 0x33a   : > { %v566_v34 = vmul.f32 %v1242_v20, %v565_v29 }
 0x33c   : > { %v567_v43 = vadd.f32 %v1242_v20, %v566_v34 }
 0x33e   : > { %806 = vadd.xlane.f32.xlu0 %v805_v16  ;;  %v571_v52 = vsel %vm1579_vm14, %v1242_v20, %v567_v43  ;;  %v871_v20 = vld [vmem:[%s1673_s5] sm:$0xff] }
 0x33f   : > { %v576_v61 = vsel %vm573_vm3, %v575_v56, %v571_v52 }
 0x340   : > { %v606_v3 = vmul.f32 %v1534_v54, %v576_v61  ;;  %v900_v54 = vld [vmem:[%s1573_s11] sm:$0xff] }
 0x3a0   : > { %v643_v18 = vpop.xlane.xlu0 %642 }
 0x3a1   : > { %1243 = vrcp.f32 %v643_v18  ;;  %v655_v26 = vand.u32 2147483648, %v643_v18  ;;  %v653_v28 = vand.u32 2147483647, %v643_v18  ;;  %vm649_vm8 = vweird.f32 %v643_v18 }
 0x3a3   : > { %v656_v31 = vor.u32 1.1754944e-38, %v655_v26  ;;  %vm654_vm10 = vcmp.eq.f32.partialorder %v653_v28, 8.507059e+37 }
 0x3a7   : > { %v1244_v21 = vpop.eup %1243 }
 0x3a8   : > { %v645_v22 = vmul.f32 %v1244_v21, %v643_v18  ;;  %vm650_vm7 = vweird.f32 %v1244_v21 }
 0x3a9   : > { %v725_v24 = vpop.xlane.xlu0 %724  ;;  %vm651_vm9 = vmor %vm649_vm8, %vm650_vm7  ;;  %v683_v37 = vpop.f32.mrf.mxu1 }
 0x3aa   : > { %v646_v25 = vsub.f32 1.0, %v645_v22  ;;  %1245 = vrcp.f32 %v725_v24  ;;  %v737_v42 = vand.u32 2147483648, %v725_v24  ;;  %v735_v45 = vand.u32 2147483647, %v725_v24 }
 0x3ab   : > { %vm731_vm15 = vweird.f32 %v725_v24  ;;  %v605_v22 = vmul.f32 %v1577_v39, %v576_v61 }
 0x3ac   : > { %v647_v27 = vmul.f32 %v1244_v21, %v646_v25  ;;  %v738_v51 = vor.u32 1.1754944e-38, %v737_v42  ;;  %vm736_vm2 = vcmp.eq.f32.partialorder %v735_v45, 8.507059e+37 }
 0x3ae   : > { %v648_v30 = vadd.f32 %v1244_v21, %v647_v27 }
 0x3b0   : > { %v1246_v32 = vpop.eup %1245  ;;  %v652_v33 = vsel %vm651_vm9, %v1244_v21, %v648_v30 }
 0x3b1   : > { %v727_v35 = vmul.f32 %v1246_v32, %v725_v24  ;;  %v657_v36 = vsel %vm654_vm10, %v656_v31, %v652_v33  ;;  %v807_v38 = vpop.xlane.xlu0 %806  ;;  %vm732_vm12 = vweird.f32 %v1246_v32  ;;  %vm867_vm10 = vcmask 195584  }
 0x3b2   : > { %v686_v40 = vmul.f32 %v683_v37, %v657_v36  ;;  %1247 = vrcp.f32 %v807_v38  ;;  %vm733_vm1 = vmor %vm731_vm15, %vm732_vm12  ;;  %v819_v62 = vand.u32 2147483648, %v807_v38  ;;  %v687_v63 = vmul.f32 %v1548_v9, %v657_v36  ;;  %v847_v9 = vpop.f32.mrf.mxu1 }
 0x3b3   : > { %v728_v41 = vsub.f32 1.0, %v727_v35  ;;  %v817_v2 = vand.u32 2147483647, %v807_v38  ;;  %vm813_vm7 = vweird.f32 %v807_v38 }
 0x3b4   : > { %854 = vrot.lane.b32.xlu0 %v686_v40, %s1366_s12  ;;  %v820_v6 = vor.u32 1.1754944e-38, %v819_v62  ;;  %v688_v7 = vadd.f32 %v687_v63, %v606_v3  ;;  %s952_s12 = sshll.u32 %s948_s28, 4  ;;  %s953_s12 = int_to_ptr.hbm [resolvable:$true] %s952_s12 }
 0x3b5   : > { %v729_v44 = vmul.f32 %v1246_v32, %v728_v41  ;;  %vm818_vm9 = vcmp.eq.f32.partialorder %v817_v2, 8.507059e+37 }
 0x3b7   : > { %v730_v49 = vadd.f32 %v1246_v32, %v729_v44 }
 0x3b8   : > { %v1248_v50 = vpop.eup %1247  ;;  %v765_v58 = vpop.f32.mrf.mxu2 }
 0x3b9   : > { %v809_v53 = vmul.f32 %v1248_v50, %v807_v38  ;;  %v734_v55 = vsel %vm733_vm1, %v1246_v32, %v730_v49  ;;  %vm814_vm4 = vweird.f32 %v1248_v50 }
 0x3ba   : > { %v739_v57 = vsel %vm736_vm2, %v738_v51, %v734_v55  ;;  %vm815_vm8 = vmor %vm813_vm7, %vm814_vm4 }
 0x3bb   : > { %v810_v59 = vsub.f32 1.0, %v809_v53  ;;  %v768_v60 = vmul.f32 %v765_v58, %v739_v57  ;;  %v769_v5 = vmul.f32 %v1556_v14, %v739_v57  ;;  %v874_v14 = vld [vmem:[%s1673_s5 + $0x18] sm:$0xff] }
 0x3bc   : > { %890 = vmatpush.msra.mxu3 %v874_v14 }
 0x3bd   : > { %v811_v1 = vmul.f32 %v1248_v50, %v810_v59  ;;  %858 = vrot.lane.b32.xlu2 %v768_v60, %s1367_s19  ;;  %v770_v15 = vadd.f32 %v769_v5, %v688_v7  ;;  %s922_s19 = scalar_lea.sflag [#allocation7], %s1567_s27 }
 0x3be   : > { %891 = vmatpush.msra.mxu3 %v873_v19 }
 0x3bf   : > { %v812_v4 = vadd.f32 %v1248_v50, %v811_v1 }
 0x3c1   : > { %v816_v8 = vsel %vm815_vm8, %v1248_v50, %v812_v4 }
 0x3c2   : > { %v821_v10 = vsel %vm818_vm9, %v820_v6, %v816_v8 }
 0x3c3   : > { %v850_v11 = vmul.f32 %v847_v9, %v821_v10  ;;  %v851_v12 = vmul.f32 %v1554_v13, %v821_v10  ;;  %v872_v13 = vld [vmem:[%s1673_s5 + $0x8] sm:$0xff] }
 0x3c4   : > { %892 = vmatpush.msra.mxu3 %v872_v13 }
 0x3c5   : > { %v852_v16 = vadd.f32 %v851_v12, %v770_v15  ;;  %862 = vrot.lane.b32.xlu1 %v850_v11, %s1368_s20  ;;  %s1263_s20 = sshra.s32 %s953_s12, 4  ;;  %s1264_s20 = int_to_ptr.hbm [resolvable:$true] %s1263_s20 }
 0x3c6   : > { %893 = vmatpush.msra.mxu3 %v871_v20  ;;  %s1265_s0 = scalar_lea.hbm %s1264_s20, 8  ;;  %p1270_p1 = scmp.lt.s32.totalorder %s1264_s20, %s1678_s10 }
 0x3c7   : > { %v901_v17 = vmul.f32 0.25, %v852_v16  ;;  %p1266_p12 = scmp.ne.s32.totalorder %s1264_s20, %s1265_s0  ;;  %p1271_p2 = scmp.lt.s32.totalorder %s1269_s16, %s1265_s0 }
 0x3c9   : > { %v902_v18 = vadd.f32 %v901_v17, %v900_v54  ;;  %p1267_p13 = pnand %p1266_p12, %p1464_p4  ;;  %p1272_p3 = por %p1271_p2, %p1270_p1 }
 0x3cb   : > { %903 = vst.msk [vmem:[%s1573_s11] sm:$0xff] %vm487_vm6, %v902_v18  ;;  %p1268_p0 = pneg %p1267_p13 }
 0x3cd   : > { %p1273_p5 = pnand %p1272_p3, %p1268_p0 }
 0x417   : > { %v859_v24 = vpop.permute.xlu2 %858 }
 0x426   : > { %v855_v21 = vpop.permute.xlu0 %854 }
 0x427   : > { %v865_v23 = vsel %vm529_vm5, %v605_v22, %v855_v21 }
 0x428   : > { %v866_v26 = vsel %vm487_vm6, %v865_v23, %v859_v24 }
 0x437   : > { %v863_v25 = vpop.permute.xlu1 %862 }
 0x438   : > { %v868_v27 = vsel %vm867_vm10, %v866_v26, %v863_v25 }
 0x439   : > { %1148 = vmatmul.msk.f32.vlgmr.msra.gmra.mxu3 %vm445_vm0, %v868_v27 }
 0x43a   : > { %1276 = shalt.err (!%p1273_p5)
}
 0x43b   : > { %1158 = dma.vmem_to_hbm [thread:$0]  (%p1464_p4), %s951_s29, 128, %s953_s12, %s922_s19   ;;  %v869_v28 = vld [vmem:[#allocation3] sm:$0xff]  ;;  %v1228_v31 = vld [vmem:[%s1674_s6] ss:$0 sm:$0xff] }
 0x43c   : > { %s933_s0 = scalar_lea.hbm %s1677_s9, %s1151_s22  ;;  %s1694_s11 = sshll.u32 %s1567_s27, 3 }
 0x43d   : > { %s415_s30 = scalar_lea.vmem [#allocation4], %s1694_s11  ;;  %s937_s28 = sshll.u32 %s933_s0, 4  ;;  %s938_s28 = int_to_ptr.hbm [resolvable:$true] %s937_s28 }
 0x43e   : > { %s935_s24 = sshll.u32 %s415_s30, 4  ;;  %s917_s29 = scalar_lea.sflag [#allocation5], %s1567_s27  ;;  %s936_s24 = int_to_ptr.vmem [resolvable:$true] %s935_s24 }
 0x43f   : > { %s1291_s12 = sshra.s32 %s938_s28, 4  ;;  %s1297_s16 = scalar_lea.hbm %s1677_s9, 16  ;;  %s1292_s12 = int_to_ptr.hbm [resolvable:$true] %s1291_s12 }
 0x440   : > { %s1293_s19 = scalar_lea.hbm %s1292_s12, 8  ;;  %p1298_p10 = scmp.lt.s32.totalorder %s1292_s12, %s1677_s9 }
 0x441   : > { %p1294_p6 = scmp.ne.s32.totalorder %s1292_s12, %s1293_s19  ;;  %p1299_p11 = scmp.lt.s32.totalorder %s1297_s16, %s1293_s19 }
 0x443   : > { %p1295_p7 = pnand %p1294_p6, %p1464_p4  ;;  %p1300_p12 = por %p1299_p11, %p1298_p10 }
 0x445   : > { %p1296_p9 = pneg %p1295_p7 }
 0x447   : > { %p1301_p13 = pnand %p1300_p12, %p1296_p9 }
 0x4bc   : > { %v895_v29 = vpop.f32.mrf.mxu3 }
 0x4bd   : > { %v898_v30 = vadd.f32 %v895_v29, %v869_v28 }
 0x4bf   : > { %899 = vst.msk [vmem:[#allocation3] sm:$0xff] %vm445_vm0, %v898_v30 }
 0x4c6   : > { %v907_v32 = vld [vmem:[#allocation3] sm:$0xff] }
 0x4c7   : > { %v912_v33 = vadd.f32 %v1228_v31, %v907_v32 }
 0x4c9   : > { %v914_v34 = vadd.f32 %v912_v33, %v1487_v0 }
 0x4cb   : > { %915 = vst.msk [vmem:[%s415_s30] sm:$0xff] %vm445_vm0, %v914_v34 }
 0x4cc   : > { %1304 = shalt.err (!%p1301_p13)
}
 0x4cd   : > { %1157 = dma.vmem_to_hbm [thread:$0]  (%p1464_p4), %s936_s24, 128, %s938_s28, %s917_s29  }
 0x4ce PF: > { %p1168_p0 = scmp.ge.s32.totalorder %s1359_s18, 2  ;;  %s964_s27 = sand.u32 1, %s1339_s13  }
 0x4cf   : > { %s965_s3 = scalar_lea.sflag [#allocation5], %s964_s27 }
 0x4d0   : > { %p1162_p1 = pnand %p1168_p0, %p1471_p8 }
 0x4d2   : > { %p1163_p2 = pneg %p1162_p1 }
 0x4d4   : > { %1330 = dma.done.wait (%p1163_p2), %s965_s3, 128  }
 0x4d5   : > { %1332 = vsyncadd (%p1163_p2), %s965_s3, 4294967168  ;;  %s975_s4 = scalar_lea.sflag [#allocation7], %s964_s27 }
 0x4d6   : > { %1334 = dma.done.wait (%p1163_p2), %s975_s4, 128  }
 0x4d7   : > { %1336 = vsyncadd (%p1163_p2), %s975_s4, 4294967168  ;;  %s27_s18 = sadd.s32 1, %s1359_s18   ;;  %s1695_s13 = smov %s1343_s14 }
 0x4d8   : > { %p24_p3 = scmp.ge.s32.totalorder %s27_s18, 4   ;;  %s1696_s14 = smov %s1347_s15 }
 0x4d9   : > { %s1697_s15 = smov %s1477_s26  ;;  %s1698_s16 = smov %s1355_s17 }
 0x4da   : > { %s1699_s17 = smov %s1701_s21  ;;  %26 = sbr.rel (!%p24_p3) target bundleno = 12 (0xc), region = 133 }
 0x4df   :  { %981 = vsyncpa [#allocation5], 1 }
 0x4e0   :  { %983 = vsyncpa [#allocation5 + $0x1], 1 }
 0x4e1   :  { %984 = vsyncpa [#allocation7], 1 }
 0x4e2   :  { %986 = vsyncpa [#allocation7 + $0x1], 1 }

</bundles_post_ra>
